<compile_context>
chip_gen: v6e
topology: v6e:2x2x1
jax: 0.10.0
libtpu: 0.0.40
codegen_flags: <defaults>
</compile_context>

<pallas_src>
import functools

import jax
import jax.numpy as jnp
from jax.experimental import pallas as pl
from jax.experimental.pallas import tpu as pltpu


def _round_up(x, m):
    return (x + m - 1) // m * m


# ----------------------------------------------------------------------------
# Pallas kernel: K-tap 1-D derivative stencil on one row tile.
#   x_ref : (bm, L)     VMEM, input rows
#   o_ref : (bm, Lout)  VMEM, output rows (Lout = L - K + 1)
#   taps  : compile-time Python floats, already divided by `resol`
# ----------------------------------------------------------------------------
def _deriv1d_kernel(x_ref, o_ref, *, taps):
    lout = o_ref.shape[-1]
    x = x_ref[...].astype(jnp.float32)          # one aligned full-tile load
    acc = taps[0] * x[:, 0:lout]
    for k in range(1, len(taps)):
        acc = acc + taps[k] * x[:, k:k + lout]
    o_ref[...] = acc.astype(o_ref.dtype)


# ----------------------------------------------------------------------------
# Jitted wrapper: VMEM-budgeted row tiling, no padding, no output slicing.
# ----------------------------------------------------------------------------
@functools.partial(jax.jit,
                   static_argnames=("taps", "block_rows", "vmem_budget_bytes"))
def conv1d_derivative_pallas(x, taps, block_rows=None,
                             vmem_budget_bytes=8 * 1024 * 1024):
    """x: (N, 1, L); taps: tuple of K floats (stencil / resol). -> (N, 1, L-K+1)."""
    N, C, L = x.shape
    assert C == 1, "Conv1dDerivative has a single input channel"
    K = len(taps)
    Lout = L - K + 1
    assert Lout >= 1
    out_dtype = x.dtype

    x2 = x.reshape(N, L)  # drop the singleton channel dim (bitcast inside jit)

    # Row-tile size from a conservative double-buffered VMEM budget.  Widths
    # are lane-padded because VMEM tiles round the last dim up to 128.
    in_bytes = jnp.dtype(x.dtype).itemsize
    out_bytes = jnp.dtype(out_dtype).itemsize
    bytes_per_row = 2 * (in_bytes * _round_up(L, 128)
                         + out_bytes * _round_up(Lout, 128))
    bm = max(8, vmem_budget_bytes // bytes_per_row // 8 * 8)
    if block_rows is not None:
        bm = max(8, _round_up(min(block_rows, bm), 8))
    # Keep >= 2 parallel grid tiles when possible (v7x has 2 TensorCores).
    if N > 8:
        bm = min(bm, _round_up(pl.cdiv(N, 2), 8))
    bm = min(bm, _round_up(N, 8))

    kernel = functools.partial(_deriv1d_kernel, taps=taps)
    out = pl.pallas_call(
        kernel,
        out_shape=jax.ShapeDtypeStruct((N, Lout), out_dtype),
        grid=(pl.cdiv(N, bm),),
        in_specs=[pl.BlockSpec((bm, L), lambda i: (i, 0))],
        out_specs=pl.BlockSpec((bm, Lout), lambda i: (i, 0)),
        compiler_params=pltpu.CompilerParams(
            dimension_semantics=("parallel",)),
    )(x2)
    return out.reshape(N, 1, Lout)


# ----------------------------------------------------------------------------
# Module wrapper mirroring the PyTorch Conv1dDerivative (forward only).
# ----------------------------------------------------------------------------
class Conv1dDerivative:
    def __init__(self, DerFilter, resol, kernel_size=3, name=''):
        self.resol = float(resol)
        self.name = name
        self.input_channels = 1
        self.output_channels = 1
        self.kernel_size = kernel_size
        self.padding = int((kernel_size - 1) / 2)  # parity only; conv uses padding=0
        self.weight = jnp.asarray(DerFilter, dtype=jnp.float32).reshape(
            self.output_channels, self.input_channels, kernel_size)
        # Fold 1/resol into compile-time tap constants (no SMEM operand).
        flat = [float(v) for v in
                jnp.asarray(DerFilter, dtype=jnp.float32).reshape(-1).tolist()]
        self.taps = tuple(v / self.resol for v in flat)

    def forward(self, x):
        # TODO(synk): if the Burgers loss applies several fixed stencils to the
        # same tensor (d/dt and d/dx), fuse them into one pallas_call with
        # multiple outputs sharing the input tile to halve input HBM traffic.
        return conv1d_derivative_pallas(x, self.taps)

    __call__ = forward


# ----------------------------------------------------------------------------
if __name__ == "__main__":
    key = jax.random.PRNGKey(0)
    key_a, key_b = jax.random.split(key)

    dt = 0.002
    deriv_filter = [[[-1.0, 0.0, 1.0]]]          # central-difference stencil
    model = Conv1dDerivative(DerFilter=deriv_filter, resol=dt * 2.0,
                             kernel_size=3, name="partial_t")

    def ref_fn(x, weight, resol):
        K = weight.shape[-1]
        Lout = x.shape[-1] - K + 1
        w = weight.reshape(-1)
        r = w[0] * x[:, :, 0:Lout]
        for k in range(1, K):
            r = r + w[k] * x[:, :, k:k + Lout]
        return r / resol

    # Multi-tile path (grid = 2, even rows), typical PhyCRNet usage: flattened
    # spatial points as the "batch", one channel, time along the last axis.
    N, L = 16, 200
    x = jax.random.normal(key_a, (N, 1, L), dtype=jnp.float32)
    out = model(x)
    jax.block_until_ready(out)
    ref = ref_fn(x, model.weight, model.resol)
    assert out.shape == (N, 1, L - 3 + 1)
    assert jnp.allclose(out, ref, rtol=1e-5, atol=1e-3), \
        float(jnp.max(jnp.abs(out - ref)))

    # Partial tail block path: row count not a multiple of the 8-row tile.
    N2 = 13
    x2 = jax.random.normal(key_b, (N2, 1, L), dtype=jnp.float32)
    out2 = model(x2)
    jax.block_until_ready(out2)
    ref2 = ref_fn(x2, model.weight, model.resol)
    assert out2.shape == (N2, 1, L - 3 + 1)
    assert jnp.allclose(out2, ref2, rtol=1e-5, atol=1e-3), \
        float(jnp.max(jnp.abs(out2 - ref2)))

    print("KERNEL_OK")
</pallas_src>

<mosaic_0001>
module attributes {stable_mosaic.version = 11 : i64} {
  func.func @_deriv1d_kernel(%arg0: i32, %arg1: memref<8x200xf32, #tpu.memory_space<vmem>>, %arg2: memref<8x198xf32, #tpu.memory_space<vmem>>) attributes {dimension_semantics = [#tpu.dimension_semantics<parallel>], iteration_bounds = array<i64: 2>, scalar_prefetch = 0 : i64, scratch_operands = 0 : i64, tpu.core_type = #tpu.core_type<tc>, window_params = [{transform_indices = @transform_0, window_bounds = array<i64: 8, 200>}, {transform_indices = @transform_1, window_bounds = array<i64: 8, 198>}]} {
    %c0 = arith.constant 0 : index
    %c0_0 = arith.constant 0 : index
    %0 = vector.load %arg1[%c0, %c0_0] : memref<8x200xf32, #tpu.memory_space<vmem>>, vector<8x200xf32>
    %1 = vector.extract_strided_slice %0 {offsets = [0, 0], sizes = [8, 198], strides = [1, 1]} : vector<8x200xf32> to vector<8x198xf32>
    %cst = arith.constant -2.500000e+02 : f32
    %2 = vector.broadcast %cst : f32 to vector<8x198xf32>
    %3 = arith.mulf %2, %1 : vector<8x198xf32>
    %4 = vector.extract_strided_slice %0 {offsets = [0, 1], sizes = [8, 198], strides = [1, 1]} : vector<8x200xf32> to vector<8x198xf32>
    %cst_1 = arith.constant 0.000000e+00 : f32
    %5 = vector.broadcast %cst_1 : f32 to vector<8x198xf32>
    %6 = arith.mulf %5, %4 : vector<8x198xf32>
    %7 = arith.addf %3, %6 : vector<8x198xf32>
    %8 = vector.extract_strided_slice %0 {offsets = [0, 2], sizes = [8, 198], strides = [1, 1]} : vector<8x200xf32> to vector<8x198xf32>
    %cst_2 = arith.constant 2.500000e+02 : f32
    %9 = vector.broadcast %cst_2 : f32 to vector<8x198xf32>
    %10 = arith.mulf %9, %8 : vector<8x198xf32>
    %11 = arith.addf %7, %10 : vector<8x198xf32>
    %c0_3 = arith.constant 0 : index
    %c0_4 = arith.constant 0 : index
    %12 = vector.load %arg2[%c0_3, %c0_4] : memref<8x198xf32, #tpu.memory_space<vmem>>, vector<8x198xf32>
    tpu.vector_store %arg2[%c0_3, %c0_4], %11 {strides = array<i32>} : memref<8x198xf32, #tpu.memory_space<vmem>>, vector<8x198xf32>,
    return
  }
  func.func @transform_0(%arg0: i32) -> (i32, i32) {
    %c0_i32 = arith.constant 0 : i32
    %c0_i32_0 = arith.constant 0 : i32
    return %arg0, %c0_i32 : i32, i32
  }
  func.func @transform_1(%arg0: i32) -> (i32, i32) {
    %c0_i32 = arith.constant 0 : i32
    %c0_i32_0 = arith.constant 0 : i32
    return %arg0, %c0_i32 : i32, i32
  }
}

</mosaic_0001>

<bundles_post_ra>
// kernel: conv1d_derivative_pallas.1
= control target key start
LH: loop header
LB: loop body
LE: loop exit
PB: predicated region body
PF: predicated region fallthrough
CT: control target
= control target key end

     0   :  { %s250_s6 = smov 0   ;;  %s267_s0 = inlined_call_operand.vmem [shape: f32[16,200], index: 0, kind: input, shape index: {}]   ;;  %s268_s1 = inlined_call_operand.vmem [shape: f32[16,198], index: 1, kind: output, shape index: {}]  }
   0x1 LB: > { %s207_s7 = sadd.s32 4294967295, %s236_s6   ;;  %p211_p0 = scmp.ge.s32.totalorder %s236_s6, 1  ;;  %s236_s6 = sphi %s250_s6, %s11_s6  }
   0x2   : > { %p87_p1 = scmp.lt.s32.totalorder %s236_s6, 3 }
   0x4   : > { %p88_p2 = pnand %p211_p0, %p87_p1 }
   0x5   : > { %p107_p3 = scmp.lt.s32.totalorder (!%p88_p2), %s207_s7, 1  ;;  %s238_s12 = smov (!%p88_p2), 126  }
   0x6   : > { %91 = sbr.rel (%p88_p2) target bundleno = 142 (0x8e), region = 24  ;;  %s239_s13 = smov (!%p88_p2), 127  }
   0xb   : > { %s270_s7 = smov (!%p107_p3, %s207_s7), 1  ;;  %vm129_vm0 = vcmask 1039360   ;;  %vm143_vm1 = vcmask 1031168   ;;  %vm150_vm2 = vcmask 572416  }
   0xc   : > { %s218_s8 = sshll.u32 %s270_s7, 4 }
   0xd   : > { %s111_s11 = scalar_lea.vmem %s267_s0, %s218_s8  ;;  %s116_s16 = scalar_lea.vmem %s268_s1, %s218_s8 }
   0xe   : > { %v117_v0 = vld [vmem:[%s111_s11] sm:$0xff]  ;;  %v118_v1 = vld [vmem:[%s111_s11 + $0x8] sm:$0xff] }
   0xf   : > { %v135_v2 = vmul.f32 250.0, %v117_v0  ;;  %v121_v3 = vmul.f32 0.0, %v117_v0  ;;  %v136_v4 = vmul.f32 250.0, %v118_v1  ;;  %v122_v5 = vmul.f32 0.0, %v118_v1 }
  0x10   : > { %v120_v8 = vmul.f32 -250.0, %v118_v1  ;;  %v119_v9 = vmul.f32 -250.0, %v117_v0 }
  0x11   : > { %139 = vrot.lane.b32.xlu1 %v135_v2, %s238_s12  ;;  %125 = vrot.lane.b32.xlu0 %v121_v3, %s239_s13 }
  0x15   : > { %141 = vrot.lane.b32.xlu1 %v136_v4, %s238_s12  ;;  %127 = vrot.lane.b32.xlu0 %v122_v5, %s239_s13 }
  0x83   : > { %v140_v6 = vpop.permute.xlu1 %139  ;;  %v126_v7 = vpop.permute.xlu0 %125 }
  0x87   : > { %v142_v10 = vpop.permute.xlu1 %141  ;;  %v128_v11 = vpop.permute.xlu0 %127 }
  0x88   : > { %v130_v12 = vsel %vm129_vm0, %v126_v7, %v128_v11  ;;  %v134_v13 = vadd.f32 %v128_v11, %v120_v8  ;;  %v144_v15 = vsel %vm143_vm1, %v140_v6, %v142_v10 }
  0x89   : > { %v133_v14 = vadd.f32 %v130_v12, %v119_v9 }
  0x8a   : > { %v148_v16 = vadd.f32 %v142_v10, %v134_v13 }
  0x8b   : > { %v147_v17 = vadd.f32 %v144_v15, %v133_v14 }
  0x8c   : > { %151 = vst.msk [vmem:[%s116_s16 + $0x8] sm:$0xff] %vm150_vm2, %v148_v16 }
  0x8d   : > { %149 = vst [vmem:[%s116_s16] sm:$0xff] %v147_v17 }
  0x8e PF: > { %s11_s6 = sadd.s32 1, %s236_s6  }
  0x8f   : > { %p8_p4 = scmp.ge.s32.totalorder %s11_s6, 4  }
  0x91   :  { %10 = sbr.rel (!%p8_p4) target bundleno = 1 (0x1), region = 54 }

</bundles_post_ra>
